<compile_context>
chip_gen: v6e
topology: v6e:2x2x1
jax: 0.10.0
libtpu: 0.0.40
codegen_flags: <defaults>
</compile_context>

<pallas_src>
import math
from functools import partial

import jax
import jax.numpy as jnp
from jax.experimental import pallas as pl
from jax.experimental.pallas import tpu as pltpu

VMEM_LIMIT_BYTES = 48 * 1024 * 1024  # conservative across v5e/v6e (128 MiB) and v7x (64 MiB)


# ------------------------------- tile helpers --------------------------------

def _seq_tile(S, max_tile=512):
    """Largest multiple-of-8 divisor of S (<= max_tile), or S itself (full block)."""
    if S % 8 != 0:
        return S
    for t in range(min(max_tile, S), 7, -8):
        if S % t == 0:
            return t
    return S


def _vocab_tile(V, max_tile=2048):
    """Largest multiple-of-128 divisor of V (<= max_tile), or V itself (full block)."""
    if V % 128 != 0:
        return V
    for t in range(min(max_tile, V), 127, -128):
        if V % t == 0:
            return t
    return V


def _cparams(num_axes):
    return pltpu.CompilerParams(
        dimension_semantics=("parallel",) * num_axes,
        vmem_limit_bytes=VMEM_LIMIT_BYTES)


# ----------------------------- in-kernel helpers ------------------------------

def _layernorm(v, g, b, eps=1e-5):
    mu = jnp.mean(v, axis=-1, keepdims=True)
    var = jnp.mean((v - mu) ** 2, axis=-1, keepdims=True)
    return (v - mu) * jax.lax.rsqrt(var + eps) * g + b


# --------------------------------- kernels ------------------------------------

def qkv_proj_kernel(x_ref, w_ref, b_ref, o_ref):
    """Fused Q/K/V projection: (tS, D) @ (D, 3D) + bias -> bf16."""
    b = b_ref[...]                                          # (1, 3D) f32, loaded once
    x = x_ref[0].astype(jnp.bfloat16)                       # (tS, D)
    y = jnp.dot(x, w_ref[...], preferred_element_type=jnp.float32) + b
    o_ref[0] = y.astype(o_ref.dtype)


def attn_ffn_kernel(num_heads, scale,
                    qkv_ref, x_ref,
                    wo_ref, bo_ref, g1_ref, be1_ref,
                    w1_ref, b1_ref, w2_ref, b2_ref, g2_ref, be2_ref,
                    o_ref):
    """Attention (all heads) + out-proj + residual + LN1 + FFN + residual + LN2
    for one (batch, q-tile) grid cell.  Everything stays in VMEM."""
    D = x_ref.shape[-1]
    tQ = x_ref.shape[1]
    hd = D // num_heads

    # Hoist small params into values once (avoid re-broadcast per use).
    bo = bo_ref[...]
    g1, be1 = g1_ref[...], be1_ref[...]
    b1, b2 = b1_ref[...], b2_ref[...]
    g2, be2 = g2_ref[...], be2_ref[...]

    qkv_full = qkv_ref[0]                                   # (S, 3D) bf16: K/V over full sequence
    row0 = pl.multiple_of(pl.program_id(1) * tQ, tQ)
    q_rows = qkv_ref[0, pl.ds(row0, tQ), :]                 # (tQ, 3D) bf16: Q rows of this tile

    # Per-head attention via static unroll over lane slices (2-D ops only).
    ctx_heads = []
    for h in range(num_heads):
        qh = q_rows[:, h * hd:(h + 1) * hd]                 # (tQ, hd)
        kh = qkv_full[:, D + h * hd:D + (h + 1) * hd]       # (S,  hd)
        vh = qkv_full[:, 2 * D + h * hd:2 * D + (h + 1) * hd]
        # scores = q @ k^T  (contract minor dims; no materialized transpose)
        s = jax.lax.dot_general(qh, kh, (((1,), (1,)), ((), ())),
                                preferred_element_type=jnp.float32) * scale
        # TODO(synk): attn_mask is None in BoringGPT.forward; add score masking here if needed.
        m = jnp.max(s, axis=-1, keepdims=True)
        e = jnp.exp(s - m)
        p = e * pl.reciprocal(jnp.sum(e, axis=-1, keepdims=True), approx=True)
        ctx_heads.append(jnp.dot(p.astype(jnp.bfloat16), vh,
                                 preferred_element_type=jnp.float32))
    ctx = jnp.concatenate(ctx_heads, axis=-1)               # (tQ, D) f32, lane-dense

    x = x_ref[0]                                            # (tQ, D) f32 residual
    attn = jnp.dot(ctx.astype(jnp.bfloat16), wo_ref[...],
                   preferred_element_type=jnp.float32) + bo
    # dropout1 is identity in eval mode
    h1 = _layernorm(x + attn, g1, be1)

    # TODO(synk): for large d_ff, add a d_ff grid axis (w1 (D,tF) / w2 (tF,D) with an
    # accumulator) so w1/w2 need not be fully VMEM-resident (v7x 64 MiB budget).
    ff = jnp.dot(h1.astype(jnp.bfloat16), w1_ref[...],
                 preferred_element_type=jnp.float32) + b1
    ff = jnp.maximum(ff, 0.0)
    ff = jnp.dot(ff.astype(jnp.bfloat16), w2_ref[...],
                 preferred_element_type=jnp.float32) + b2

    # dropout2 is identity in eval mode
    o_ref[0] = _layernorm(h1 + ff, g2, be2)


def lm_head_kernel(x_ref, g_ref, b_ref, w_ref, bo_ref, o_ref):
    """Final LayerNorm + vocab-tiled LM head (LN recompute per vocab tile is cheap)."""
    g, b, bo = g_ref[...], b_ref[...], bo_ref[...]
    h = _layernorm(x_ref[0], g, b)                          # (tS, D) f32
    o_ref[0] = jnp.dot(h.astype(jnp.bfloat16), w_ref[...],
                       preferred_element_type=jnp.float32) + bo


# --------------------------------- wrappers ------------------------------------

def run_qkv(x, wqkv, bqkv):
    B, S, D = x.shape
    D3 = wqkv.shape[1]
    tS = _seq_tile(S)
    return pl.pallas_call(
        qkv_proj_kernel,
        out_shape=jax.ShapeDtypeStruct((B, S, D3), jnp.bfloat16),
        grid=(B, S // tS),
        in_specs=[pl.BlockSpec((1, tS, D), lambda b, s: (b, s, 0)),
                  pl.BlockSpec((D, D3), lambda b, s: (0, 0)),
                  pl.BlockSpec((1, D3), lambda b, s: (0, 0))],
        out_specs=pl.BlockSpec((1, tS, D3), lambda b, s: (b, s, 0)),
        compiler_params=_cparams(2),
    )(x, wqkv, bqkv)


def run_attn_ffn(qkv, x, bp, num_heads):
    B, S, D = x.shape
    D3 = qkv.shape[-1]
    tQ = _seq_tile(S)
    scale = 1.0 / math.sqrt(D // num_heads)
    weights = [bp['wo'], bp['bo'], bp['g1'], bp['be1'],
               bp['w1'], bp['b1'], bp['w2'], bp['b2'], bp['g2'], bp['be2']]
    in_specs = [pl.BlockSpec((1, S, D3), lambda b, s: (b, 0, 0)),   # full-seq QKV (stays resident across q-tiles)
                pl.BlockSpec((1, tQ, D), lambda b, s: (b, s, 0))]   # x residual tile (f32)
    in_specs += [pl.BlockSpec(w.shape, lambda b, s: (0, 0)) for w in weights]
    return pl.pallas_call(
        partial(attn_ffn_kernel, num_heads, scale),
        out_shape=jax.ShapeDtypeStruct((B, S, D), jnp.float32),
        grid=(B, S // tQ),
        in_specs=in_specs,
        out_specs=pl.BlockSpec((1, tQ, D), lambda b, s: (b, s, 0)),
        compiler_params=_cparams(2),
    )(qkv, x, *weights)


def run_lm_head(x, gf, bf, wout, bout):
    B, S, D = x.shape
    V = wout.shape[1]
    tS = _seq_tile(S)
    tV = _vocab_tile(V)
    return pl.pallas_call(
        lm_head_kernel,
        out_shape=jax.ShapeDtypeStruct((B, S, V), jnp.float32),
        grid=(B, S // tS, V // tV),
        in_specs=[pl.BlockSpec((1, tS, D), lambda b, s, v: (b, s, 0)),
                  pl.BlockSpec((1, D), lambda b, s, v: (0, 0)),
                  pl.BlockSpec((1, D), lambda b, s, v: (0, 0)),
                  pl.BlockSpec((D, tV), lambda b, s, v: (0, v)),
                  pl.BlockSpec((1, tV), lambda b, s, v: (0, v))],
        out_specs=pl.BlockSpec((1, tS, tV), lambda b, s, v: (b, s, v)),
        compiler_params=_cparams(3),
    )(x, gf, bf, wout, bout)


def run_block(x, bp, num_heads):
    qkv = run_qkv(x, bp['wqkv'], bp['bqkv'])        # (B, S, 3D) bf16, single wide matmul
    return run_attn_ffn(qkv, x, bp, num_heads)      # (B, S, D) f32, fully fused rest of block


def boring_gpt_forward(tokens, params, num_heads):
    # Embedding lookup + learned positional encoding (plain-JAX glue: gather has
    # no clean rectangular BlockSpec pattern).
    S = tokens.shape[1]
    x = jnp.take(params['emb'], tokens, axis=0) + params['pos'][:S][None, :, :]
    for bp in params['blocks']:
        x = run_block(x, bp, num_heads)
    return run_lm_head(x, params['gf'], params['bf'], params['wout'], params['bout'])


# ------------------------------ parameter init ---------------------------------

def init_params(key, vocab_size, d_model, num_heads, num_layers, d_ff, max_len):
    """PyTorch-like f32 parameters (weights stored (in_features, out_features))."""
    def nrm(k, shape, scale=0.02):
        return (scale * jax.random.normal(k, shape)).astype(jnp.float32)

    keys = jax.random.split(key, 4 + num_layers)
    params = {
        'emb': nrm(keys[0], (vocab_size, d_model)),
        'pos': nrm(keys[1], (max_len, d_model)),
        'gf': jnp.ones((1, d_model), jnp.float32),
        'bf': jnp.zeros((1, d_model), jnp.float32),
        'wout': nrm(keys[2], (d_model, vocab_size)),
        'bout': jnp.zeros((1, vocab_size), jnp.float32),
        'blocks': [],
    }
    for li in range(num_layers):
        bk = jax.random.split(keys[4 + li], 6)
        params['blocks'].append({
            'wq': nrm(bk[0], (d_model, d_model)), 'bq': jnp.zeros((1, d_model), jnp.float32),
            'wk': nrm(bk[1], (d_model, d_model)), 'bk': jnp.zeros((1, d_model), jnp.float32),
            'wv': nrm(bk[2], (d_model, d_model)), 'bv': jnp.zeros((1, d_model), jnp.float32),
            'wo': nrm(bk[3], (d_model, d_model)), 'bo': jnp.zeros((1, d_model), jnp.float32),
            'g1': jnp.ones((1, d_model), jnp.float32), 'be1': jnp.zeros((1, d_model), jnp.float32),
            'w1': nrm(bk[4], (d_model, d_ff)), 'b1': jnp.zeros((1, d_ff), jnp.float32),
            'w2': nrm(bk[5], (d_ff, d_model)), 'b2': jnp.zeros((1, d_model), jnp.float32),
            'g2': jnp.ones((1, d_model), jnp.float32), 'be2': jnp.zeros((1, d_model), jnp.float32),
        })
    return params


def prepare_params(params, num_heads):
    """Pack QKV into one (D, 3D) weight and cast matmul weights to bf16."""
    d_model = params['emb'].shape[1]
    assert d_model % num_heads == 0, "d_model must be divisible by num_heads"
    prepped = {
        'emb': params['emb'], 'pos': params['pos'],
        'gf': params['gf'], 'bf': params['bf'],
        'wout': params['wout'].astype(jnp.bfloat16), 'bout': params['bout'],
        'blocks': [],
    }
    for bp in params['blocks']:
        prepped['blocks'].append({
            'wqkv': jnp.concatenate([bp['wq'], bp['wk'], bp['wv']], axis=1).astype(jnp.bfloat16),
            'bqkv': jnp.concatenate([bp['bq'], bp['bk'], bp['bv']], axis=1),
            'wo': bp['wo'].astype(jnp.bfloat16), 'bo': bp['bo'],
            'g1': bp['g1'], 'be1': bp['be1'],
            'w1': bp['w1'].astype(jnp.bfloat16), 'b1': bp['b1'],
            'w2': bp['w2'].astype(jnp.bfloat16), 'b2': bp['b2'],
            'g2': bp['g2'], 'be2': bp['be2'],
        })
    return prepped


# ----------------------------------- main ---------------------------------------

if __name__ == "__main__":
    vocab_size, d_model, num_heads, num_layers, d_ff, max_len = 64, 32, 4, 2, 64, 16
    B, S = 2, 8

    key = jax.random.PRNGKey(0)
    pkey, tkey = jax.random.split(key)
    raw_params = init_params(pkey, vocab_size, d_model, num_heads, num_layers, d_ff, max_len)
    params = prepare_params(raw_params, num_heads)
    tokens = jax.random.randint(tkey, (B, S), 0, vocab_size, dtype=jnp.int32)

    logits = boring_gpt_forward(tokens, params, num_heads)
    logits = jax.block_until_ready(logits)
    assert logits.shape == (B, S, vocab_size)
    print("KERNEL_OK")
</pallas_src>

<mosaic_0001>
module attributes {stable_mosaic.version = 11 : i64} {
  func.func @qkv_proj_kernel(%arg0: i32, %arg1: i32, %arg2: memref<1x8x32xf32, #tpu.memory_space<vmem>>, %arg3: memref<32x96xbf16, #tpu.memory_space<vmem>>, %arg4: memref<1x96xf32, #tpu.memory_space<vmem>>, %arg5: memref<1x8x96xbf16, #tpu.memory_space<vmem>>) attributes {dimension_semantics = [#tpu.dimension_semantics<parallel>, #tpu.dimension_semantics<parallel>], iteration_bounds = array<i64: 2, 1>, scalar_prefetch = 0 : i64, scratch_operands = 0 : i64, tpu.core_type = #tpu.core_type<tc>, window_params = [{transform_indices = @transform_0, window_bounds = array<i64: 1, 8, 32>}, {pipeline_mode = #tpu.pipeline_mode<synchronous>, transform_indices = @transform_1, window_bounds = array<i64: 32, 96>}, {pipeline_mode = #tpu.pipeline_mode<synchronous>, transform_indices = @transform_2, window_bounds = array<i64: 1, 96>}, {transform_indices = @transform_3, window_bounds = array<i64: 1, 8, 96>}]} {
    %c0 = arith.constant 0 : index
    %c0_0 = arith.constant 0 : index
    %0 = vector.load %arg4[%c0, %c0_0] : memref<1x96xf32, #tpu.memory_space<vmem>>, vector<1x96xf32>
    %c0_1 = arith.constant 0 : index
    %c0_2 = arith.constant 0 : index
    %c0_3 = arith.constant 0 : index
    %1 = vector.load %arg2[%c0_1, %c0_2, %c0_3] : memref<1x8x32xf32, #tpu.memory_space<vmem>>, vector<1x8x32xf32>
    %2 = vector.shape_cast %1 : vector<1x8x32xf32> to vector<8x32xf32>
    %3 = arith.truncf %2 : vector<8x32xf32> to vector<8x32xbf16>
    %c0_4 = arith.constant 0 : index
    %c0_5 = arith.constant 0 : index
    %4 = vector.load %arg3[%c0_4, %c0_5] : memref<32x96xbf16, #tpu.memory_space<vmem>>, vector<32x96xbf16>
    %cst = arith.constant dense<0.000000e+00> : vector<8x96xf32>
    %5 = tpu.matmul %3, %4, %cst {dimension_numbers = #tpu.dot_dimension_numbers<[1], [0], [0], [1], [0, 0, 1, 1], [], []>} : vector<8x32xbf16>, vector<32x96xbf16>, vector<8x96xf32> -> vector<8x96xf32>
    %6 = vector.broadcast %0 : vector<1x96xf32> to vector<8x96xf32>
    %7 = arith.addf %5, %6 : vector<8x96xf32>
    %8 = arith.truncf %7 : vector<8x96xf32> to vector<8x96xbf16>
    %c0_6 = arith.constant 0 : index
    %c0_7 = arith.constant 0 : index
    %c0_8 = arith.constant 0 : index
    %9 = vector.load %arg5[%c0_6, %c0_7, %c0_8] : memref<1x8x96xbf16, #tpu.memory_space<vmem>>, vector<1x8x96xbf16>
    %10 = vector.shape_cast %9 : vector<1x8x96xbf16> to vector<8x96xbf16>
    %11 = vector.shape_cast %8 : vector<8x96xbf16> to vector<1x8x96xbf16>
    tpu.vector_store %arg5[%c0_6, %c0_7, %c0_8], %11 {strides = array<i32>} : memref<1x8x96xbf16, #tpu.memory_space<vmem>>, vector<1x8x96xbf16>,
    return
  }
  func.func @transform_0(%arg0: i32, %arg1: i32) -> (i32, i32, i32) {
    %c0_i32 = arith.constant 0 : i32
    %c0_i32_0 = arith.constant 0 : i32
    return %arg0, %arg1, %c0_i32 : i32, i32, i32
  }
  func.func @transform_1(%arg0: i32, %arg1: i32) -> (i32, i32) {
    %c0_i32 = arith.constant 0 : i32
    %c0_i32_0 = arith.constant 0 : i32
    %c0_i32_1 = arith.constant 0 : i32
    return %c0_i32, %c0_i32_0 : i32, i32
  }
  func.func @transform_2(%arg0: i32, %arg1: i32) -> (i32, i32) {
    %c0_i32 = arith.constant 0 : i32
    %c0_i32_0 = arith.constant 0 : i32
    %c0_i32_1 = arith.constant 0 : i32
    return %c0_i32, %c0_i32_0 : i32, i32
  }
  func.func @transform_3(%arg0: i32, %arg1: i32) -> (i32, i32, i32) {
    %c0_i32 = arith.constant 0 : i32
    %c0_i32_0 = arith.constant 0 : i32
    return %arg0, %arg1, %c0_i32 : i32, i32, i32
  }
}

</mosaic_0001>

<bundles_post_ra>
// kernel: tpu_custom_call.1
= control target key start
LH: loop header
LB: loop body
LE: loop exit
PB: predicated region body
PF: predicated region fallthrough
CT: control target
= control target key end

     0   :  { %8 = vsyncpa [#allocation3], 0  ;;  %s855_s0 = inlined_call_operand.hbm [shape: f32[2,8,32], index: 0, kind: input, shape index: {}]   ;;  %s856_s1 = inlined_call_operand.hbm [shape: bf16[32,96], index: 1, kind: input, shape index: {}]   ;;  %s857_s2 = inlined_call_operand.vmem [shape: f32[1,96], index: 2, kind: input, shape index: {}]   ;;  %s858_s3 = inlined_call_operand.hbm [shape: bf16[2,8,96], index: 3, kind: output, shape index: {}]  }
   0x1   :  { %10 = vsyncpa [#allocation3 + $0x1], 0 }
   0x2   :  { %11 = vsyncpa [#allocation6], 0 }
   0x3   :  { %12 = vsyncpa [#allocation4], 0 }
   0x4   :  { %14 = vsyncpa [#allocation4 + $0x1], 0  ;;  %s672_s12 = smov 0   ;;  %s674_s13 = smov 0  }
   0x5   :  { %s676_s14 = smov 0   ;;  %s678_s15 = smov 0  }
   0x6   :  { %s680_s16 = smov 0   ;;  %s682_s17 = smov 0  }
   0x7 LB: > { %s396_s18 = sadd.s32 4294967295, %s643_s17   ;;  %s397_s19 = sadd.s32 4294967294, %s643_s17   ;;  %s643_s17 = sphi %s682_s17, %s20_s17   ;;  %s639_s16 = sphi %s680_s16, %s876_s16   ;;  %s635_s15 = sphi %s678_s15, %s875_s15   ;;  %s631_s14 = sphi %s676_s14, %s874_s14   ;;  %s627_s13 = sphi %s674_s13, %s873_s13   ;;  %s623_s12 = sphi %s672_s12, %s872_s12  }
   0x8   : > { %p54_p0 = scmp.ne.s32.totalorder %s627_s13, %s623_s12  ;;  %p706_p1 = scmp.eq.s32.totalorder %s396_s18, 0 }
   0x9   : > { %p710_p2 = scmp.eq.s32.totalorder %s396_s18, 1  ;;  %p128_p3 = scmp.eq.s32.totalorder %s397_s19, 1 }
   0xa   : > { %p716_p4 = por %p706_p1, %p54_p0  ;;  %p398_p5 = scmp.ge.s32.totalorder %s643_s17, 1 }
   0xb   : > { %p721_p6 = por %p128_p3, %p54_p0  ;;  %p135_p7 = scmp.lt.s32.totalorder %s643_s17, 3 }
   0xc   : > { %s862_s22 = scalar_select %p716_p4, 1, 0 }
   0xd   : > { %s863_s23 = scalar_select %p721_p6, 1, 0 }
   0xe   : > { %p726_p8 = pnand %p398_p5, %p135_p7  ;;  %s645_s25 = smov [#allocation5]  }
   0xf   : > { %s147_s26 = sshll.u32 %s645_s25, 4  ;;  %s32_s28 = sadd.s32 1, %s639_s16  ;;  %s148_s26 = int_to_ptr.vmem [resolvable:$true] %s147_s26 }
  0x10   : > { %p434_p9 = pneg %p726_p8  ;;  %s516_s29 = scalar_lea.vmem %s148_s26, 256 }
  0x11   : > { %p517_p13 = scmp.ne.s32.totalorder %s148_s26, %s516_s29  ;;  %p524_p5 = scmp.lt.s32.totalorder %s148_s26, %s148_s26 }
  0x12   : > { %p735_p11 = pnand %p434_p9, %p706_p1  ;;  %p525_p7 = scmp.lt.s32.totalorder %s516_s29, %s516_s29 }
  0x14   : > { %p507_p12 = pneg %p735_p11  ;;  %p526_p6 = por %p525_p7, %p524_p5 }
  0x16   : > { %p519_p0 = pnand %p517_p13, %p507_p12 }
  0x18   : > { %p520_p3 = pneg %p519_p0 }
  0x1a   : > { %p527_p4 = pnand %p526_p6, %p520_p3 }
  0x1c   : > { %530 = shalt.err (!%p527_p4)
}
  0x1d   : > { %s646_s30 = smov 64   ;;  %s647_s4 = smov 4  }
  0x1e   : > { %437 = dma.hbm_to_vmem [thread:$0]  (!%p735_p11), %s856_s1, 256, %s148_s26, [#allocation6], %s646_s30, %s646_s30, %s647_s4  }
  0x1f   : > { %p34_p6 = scmp.ge.s32.totalorder %s32_s28, 2  ;;  %s41_s7 = sadd.s32 1, %s631_s14 }
  0x20   : > { %p48_p4 = scmp.ne.s32.totalorder %s631_s14, %s627_s13  ;;  %p49_p9 = scmp.eq.s32.totalorder %s643_s17, 0 }
  0x21   : > { %s878_s28 = smov (%p34_p6, %s32_s28), 0  ;;  %p447_p0 = scmp.lt.s32.totalorder %s643_s17, 2 }
  0x22   : > { %p753_p12 = por %p49_p9, %p48_p4  ;;  %p759_p13 = por %p710_p2, %p48_p4 }
  0x23   : > { %s36_s10 = ssub.s32 %s639_s16, %s878_s28  ;;  %s164_s11 = sand.u32 1, %s631_s14  }
  0x24   : > { %p39_p11 = scmp.eq.s32.totalorder %s36_s10, 0  ;;  %s401_s18 = sshll.u32 %s164_s11, 3 }
  0x25   : > { %s402_s25 = sshll.u32 %s639_s16, 7  ;;  %s168_s30 = scalar_lea.vmem [#allocation2], %s401_s18 }
  0x26   : > { %s768_s19 = scalar_select %p39_p11, %s631_s14, %s41_s7  }
  0x27   : > { %s174_s29 = scalar_lea.hbm %s855_s0, %s402_s25  ;;  %s176_s4 = sshll.u32 %s168_s30, 4  ;;  %s177_s4 = int_to_ptr.vmem [resolvable:$true] %s176_s4 }
  0x28   : > { %p776_p2 = pnand %p447_p0, %p753_p12  ;;  %s165_s5 = scalar_lea.sflag [#allocation3], %s164_s11 }
  0x29   : > { %s544_s6 = scalar_lea.vmem %s177_s4, 128  ;;  %s648_s7 = smov [#allocation2]  }
  0x2a   : > { %p533_p3 = pneg %p776_p2  ;;  %p545_p5 = scmp.ne.s32.totalorder %s177_s4, %s544_s6 }
  0x2b   : > { %s549_s10 = sshll.u32 %s648_s7, 4  ;;  %s550_s10 = int_to_ptr.vmem [resolvable:$false] %s549_s10 }
  0x2c   : > { %p547_p7 = pnand %p545_p5, %p533_p3  ;;  %s551_s25 = scalar_lea.vmem %s550_s10, 256 }
  0x2d   : > { %p552_p4 = scmp.lt.s32.totalorder %s177_s4, %s550_s10  ;;  %p553_p9 = scmp.lt.s32.totalorder %s551_s25, %s544_s6 }
  0x2e   : > { %p548_p6 = pneg %p547_p7 }
  0x2f   : > { %p554_p11 = por %p553_p9, %p552_p4 }
  0x31   : > { %p555_p10 = pnand %p554_p11, %p548_p6 }
  0x33   : > { %558 = shalt.err (!%p555_p10)
}
  0x34   : > { %441 = dma.hbm_to_vmem [thread:$0]  (!%p776_p2), %s174_s29, 128, %s177_s4, %s165_s5  }
  0x35   : > { %185 = sbr.rel (%p726_p8) target bundleno = 281 (0x119), region = 32  ;;  %s787_s8 = sand.u32 (!%p726_p8), 1, %s627_s13  }
  0x36   : > { %s404_s11 = sshll.u32 (!%p726_p8), %s787_s8, 3  ;;  %s188_s18 = scalar_lea.sflag (!%p726_p8), [#allocation3], %s787_s8 }
  0x37   : > { %s191_s26 = scalar_lea.vmem (!%p726_p8), [#allocation2], %s404_s11  ;;  %p869_p12 = scmp.ne.s32.totalorder (!%p726_p8), %s862_s22, 0 }
  0x3a   : > { %610 = dma.done.wait (%p869_p12), %s188_s18, 128  }
  0x3b   : > { %612 = vsyncadd (%p869_p12), %s188_s18, 4294967168 }
  0x3c   : > { %614 = dma.done.wait (%p706_p1), [#allocation6], 256  }
  0x3d   : > { %616 = vsyncadd (%p706_p1), [#allocation6], 4294967040  ;;  %v649_v0 = vmov 0.0   ;;  %vm650_vm0 = vmmov 0   ;;  %v503_v1 = vld [vmem:[#allocation5 + $0x8] sm:$0xff]   ;;  %v504_v2 = vld [vmem:[#allocation5] sm:$0xff]  }
  0x3e   : > { %418 = vmatprep.subr.bf16.mxu0 %v649_v0  ;;  %422 = vmatprep.mubr.msk.bf16.mxu0 %vm650_vm0, %v649_v0  ;;  %v220_v3 = vld [vmem:[%s191_s26] sm:$0xff]  ;;  %vm244_vm1 = vcmask 261120   ;;  %s406_s22 = sshll.u32 %s787_s8, 2  ;;  %s412_s27 = sshll.u32 %s635_s15, 6  ;;  %vm289_vm2 = vcmask 781312  }
  0x3f   : > { %419 = vmatpush3.bf16.msra.mxu0 %v503_v1  ;;  %v221_v4 = vpack.c.bf16 %v220_v3, %v220_v3  ;;  %v407_v5 = vld [vmem:[%s857_s2] ss:$0 sm:$0xff]  ;;  %s217_s29 = scalar_lea.vmem [#allocation7], %s406_s22  ;;  %s807_s5 = scalar_lea.hbm %s858_s3, %s412_s27 }
  0x40   : > { %420 = vmatprep.subr.bf16.mxu0 %v649_v0  ;;  %s306_s30 = sshll.u32 %s217_s29, 4  ;;  %s292_s15 = scalar_lea.sflag [#allocation4], %s787_s8  ;;  %s809_s30 = int_to_ptr.vmem [resolvable:$true] %s306_s30 }
  0x41   : > { %s559_s6 = scalar_lea.vmem %s809_s30, 64  ;;  %s651_s7 = smov [#allocation7]  }
  0x42   : > { %p560_p1 = scmp.ne.s32.totalorder %s809_s30, %s559_s6  ;;  %s563_s10 = sshll.u32 %s651_s7, 4  ;;  %s564_s10 = int_to_ptr.vmem [resolvable:$false] %s563_s10 }
  0x43   : > { %421 = vmatpush3.bf16.msra.mxu0 %v504_v2  ;;  %s565_s25 = scalar_lea.vmem %s564_s10, 128  ;;  %p566_p0 = scmp.lt.s32.totalorder %s809_s30, %s564_s10 }
  0x44   : > { %p561_p8 = pnand %p560_p1, %p759_p13  ;;  %p567_p2 = scmp.lt.s32.totalorder %s565_s25, %s559_s6 }
  0x46   : > { %423 = vmatmul.mubr.msk.bf16.vlgmr.msra.gmra.mxu0 %vm244_vm1, %v221_v4  ;;  %p562_p10 = pneg %p561_p8  ;;  %p568_p3 = por %p567_p2, %p566_p0 }
  0x48   : > { %p569_p5 = pnand %p568_p3, %p562_p10 }
 0x106   : > { %v282_v6 = vpop.f32.mrf.mxu0 }
 0x107   : > { %v283_v7 = vadd.f32 %v407_v5, %v282_v6 }
 0x108   : > { %v424_v8 = vpop.f32.mrf.mxu0 }
 0x109   : > { %v288_v9 = vpack.c.bf16 %v283_v7, %v283_v7 }
 0x10a   : > { %v285_v10 = vpop.f32.mrf.mxu0 }
 0x10b   : > { %290 = vst.msk [vmem:[%s217_s29] sm:$0xf] %vm289_vm2, %v288_v9 }
 0x10c   : > { %v425_v11 = vpop.f32.mrf.mxu0 }
 0x10d   : > { %572 = shalt.err (!%p569_p5)
}
 0x10e   : > { %s573_s11 = scalar_lea.hbm %s807_s5, 64  ;;  %s577_s26 = scalar_lea.hbm %s858_s3, 128 }
 0x10f   : > { %p574_p7 = scmp.ne.s32.totalorder %s807_s5, %s573_s11  ;;  %p578_p9 = scmp.lt.s32.totalorder %s807_s5, %s858_s3 }
 0x110   : > { %p579_p11 = scmp.lt.s32.totalorder %s577_s26, %s573_s11 }
 0x111   : > { %p575_p6 = pnand %p574_p7, %p759_p13 }
 0x112   : > { %p580_p12 = por %p579_p11, %p578_p9 }
 0x113   : > { %p576_p4 = pneg %p575_p6 }
 0x115   : > { %p581_p1 = pnand %p580_p12, %p576_p4 }
 0x117   : > { %584 = shalt.err (!%p581_p1)
}
 0x118   : > { %432 = dma.vmem_to_hbm [thread:$0]  (%p759_p13), %s809_s30, 64, %s807_s5, %s292_s15  }
 0x119 PF: > { %s318_s20 = sand.u32 1, %s623_s12   ;;  %p870_p8 = scmp.ne.s32.totalorder %s863_s23, 0 }
 0x11a   : > { %p871_p10 = scmp.ge.s32.totalorder %s643_s17, 2  ;;  %s319_s27 = scalar_lea.sflag [#allocation4], %s318_s20 }
 0x11c   : > { %p443_p0 = pnand %p871_p10, %p870_p8 }
 0x11e   : > { %p444_p2 = pneg %p443_p0 }
 0x120   : > { %618 = dma.done.wait (%p444_p2), %s319_s27, 64  }
 0x121   : > { %620 = vsyncadd (%p444_p2), %s319_s27, 4294967232  ;;  %s20_s17 = sadd.s32 1, %s643_s17   ;;  %s872_s12 = smov %s627_s13 }
 0x122   : > { %p17_p3 = scmp.ge.s32.totalorder %s20_s17, 4   ;;  %s873_s13 = smov %s631_s14 }
 0x123   : > { %s874_s14 = smov %s768_s19  ;;  %s875_s15 = smov %s639_s16 }
 0x124   : > { %s876_s16 = smov %s878_s28  ;;  %19 = sbr.rel (!%p17_p3) target bundleno = 7 (0x7), region = 81 }
 0x129   :  { %324 = vsyncpa [#allocation3], 1 }
 0x12a   :  { %326 = vsyncpa [#allocation3 + $0x1], 1 }
 0x12b   :  { %327 = vsyncpa [#allocation6], 1 }
 0x12c   :  { %328 = vsyncpa [#allocation4], 1 }
 0x12d   :  { %330 = vsyncpa [#allocation4 + $0x1], 1 }

</bundles_post_ra>
